<compile_context>
chip_gen: v7x
topology: tpu7x:2x2x1
jax: 0.10.0
libtpu: 0.0.40
codegen_flags: <defaults>
</compile_context>

<pallas_src>
import jax
import jax.numpy as jnp
from jax.experimental import pallas as pl
from jax.experimental.pallas import tpu as pltpu


def _cdiv(a, b):
    return -(-a // b)


def _device_kind():
    try:
        return jax.devices()[0].device_kind.lower()
    except Exception:
        return ""


def _make_kernel(upcast_product):
    def kernel(xi_ref, xj_ref, w1_ref, b1_ref, w2_ref, b2_ref, w3_ref, b3_ref,
               o_ref):
        xi = xi_ref[...]
        xj = xj_ref[...]
        if upcast_product:
            # v5e and older: VPU has no bf16 multiply — upcast, multiply, downcast.
            x = (xi.astype(jnp.float32) * xj.astype(jnp.float32)).astype(jnp.bfloat16)
        else:
            # v6e / v7x: bf16 VPU — multiply directly, feed the MXU in bf16.
            x = (xi * xj).astype(jnp.bfloat16)

        # Layer 1 (block-diagonal weights): bf16 MXU inputs, f32 accumulation.
        h = jnp.dot(x, w1_ref[...], preferred_element_type=jnp.float32) + b1_ref[...]
        h = jnp.maximum(h, 0.0).astype(jnp.bfloat16)
        # TODO(synk): dropout omitted — module evaluated in inference mode (identity).

        # Layer 2 (block-diagonal weights).
        h = jnp.dot(h, w2_ref[...], preferred_element_type=jnp.float32) + b2_ref[...]
        h = jnp.maximum(h, 0.0).astype(jnp.bfloat16)

        # Final layer, transposed so the result is lane-dense:
        #   (pack, pack*H) x (tile_rows, pack*H)^T -> (pack, tile_rows)
        z = jax.lax.dot_general(
            w3_ref[...], h,
            dimension_numbers=(((1,), (1,)), ((), ())),
            preferred_element_type=jnp.float32,
        ) + b3_ref[...]
        o_ref[0] = jax.nn.sigmoid(z)   # full-lane store into (1, pack, tile_rows)

    return kernel


def _pick_tile_rows(rows, pack, is_v7x):
    """Batch tile in *packed* rows (one packed row = `pack` edges).

    - cap ~16K edges per step (~8K on v7x: 64 MiB VMEM -> keep headroom);
    - single step for small batches (per-step overhead ~0.35 us dominates),
      except a 2-way split on v7x when each half still has >= ~2K edges;
    - multiples of 128 rows when tiling so the lane-dense output block stays
      unmasked and sublanes stay aligned;
    - on v7x prefer an even step count so both TensorCores get equal work.
    """
    cap_edges = 8192 if is_v7x else 16384
    cap = max(128, cap_edges // pack)
    if rows <= cap:
        if is_v7x and rows * pack >= 4096 and rows > 256:
            return _cdiv(_cdiv(rows, 2), 128) * 128
        return rows                      # single step; block == full array
    tile = cap
    if is_v7x:
        steps = _cdiv(rows, tile)
        if steps % 2:
            tile = _cdiv(_cdiv(rows, steps + 1), 128) * 128
    return max(128, tile)


def link_predictor(x_i, x_j, params, *, tile_rows=None):
    """params = (w1, b1, w2, b2, w3, b3) in f32.
    w1: [C, H]; w2: [H, H]; b1, b2: [1, H]; w3: [1, H] (PyTorch layout); b3: [1, 1]."""
    w1, b1, w2, b2, w3, b3 = params
    N, C = x_i.shape
    H = w1.shape[1]
    assert x_j.shape == (N, C)
    assert w1.shape == (C, H) and w2.shape == (H, H)
    assert w3.shape == (1, H) and b3.shape == (1, 1)   # out_channels == 1

    kind = _device_kind()
    is_v7x = "v7" in kind
    upcast_product = any(v in kind for v in ("v2", "v3", "v4", "v5"))

    # ---- pack `pack` edges per 128-lane row --------------------------------
    pack = max(1, 128 // max(C, H))
    n_pack = _cdiv(N, pack) * pack
    if n_pack != N:
        # TODO(synk): tiny pad (< pack rows) so the packing reshape is legal;
        # ideally x_i / x_j arrive already in (rows, pack*C) layout upstream.
        padcfg = ((0, n_pack - N), (0, 0))
        x_i = jnp.pad(x_i, padcfg)
        x_j = jnp.pad(x_j, padcfg)
    rows = n_pack // pack
    xi_p = x_i.reshape(rows, pack * C).astype(jnp.bfloat16)
    xj_p = x_j.reshape(rows, pack * C).astype(jnp.bfloat16)

    # ---- block-diagonal / bf16 parameter prep (once, param-sized) ----------
    eye = jnp.eye(pack, dtype=jnp.float32)
    w1_blk = jnp.kron(eye, w1.astype(jnp.float32)).astype(jnp.bfloat16)   # (pack*C, pack*H)
    w2_blk = jnp.kron(eye, w2.astype(jnp.float32)).astype(jnp.bfloat16)   # (pack*H, pack*H)
    w3_blk = jnp.kron(eye, w3.astype(jnp.float32)).astype(jnp.bfloat16)   # (pack,   pack*H)
    b1_blk = jnp.tile(b1.astype(jnp.float32), (1, pack))                  # (1, pack*H)
    b2_blk = jnp.tile(b2.astype(jnp.float32), (1, pack))                  # (1, pack*H)
    b3_f32 = b3.astype(jnp.float32)                                       # (1, 1)

    # ---- grid / tiling ------------------------------------------------------
    if tile_rows is None:
        tile_rows = _pick_tile_rows(rows, pack, is_v7x)
    grid_n = _cdiv(rows, tile_rows)   # tail block may read OOB garbage; sliced off

    x_spec = pl.BlockSpec((tile_rows, pack * C), lambda i: (i, 0))
    o_spec = pl.BlockSpec((1, pack, tile_rows), lambda i: (i, 0, 0))

    def full(a):   # weights / biases: broadcast whole array to every grid step
        return pl.BlockSpec(a.shape, lambda i, nd=a.ndim: (0,) * nd)

    # ---- cost estimate (real packed / lane-padded operand bytes) ------------
    lane = 128
    in_minor = _cdiv(pack * C, lane) * lane
    in_bytes = 2 * rows * in_minor * xi_p.dtype.itemsize
    out_bytes = grid_n * pack * (_cdiv(tile_rows, lane) * lane) * 4
    param_list = (w1_blk, b1_blk, w2_blk, b2_blk, w3_blk, b3_f32)
    param_bytes = sum(int(p.size) * p.dtype.itemsize for p in param_list)
    cost = pl.CostEstimate(
        flops=2 * n_pack * (C * H + H * H + H) + n_pack * (C + 2 * H),
        transcendentals=n_pack,                       # one exp per sigmoid
        bytes_accessed=in_bytes + out_bytes + param_bytes,
    )

    vmem_limit = (48 if is_v7x else 64) * 1024 * 1024

    out = pl.pallas_call(
        _make_kernel(upcast_product),
        out_shape=jax.ShapeDtypeStruct((grid_n, pack, tile_rows), jnp.float32),
        grid_spec=pltpu.PrefetchScalarGridSpec(
            num_scalar_prefetch=0,
            grid=(grid_n,),
            in_specs=[
                x_spec, x_spec,
                full(w1_blk), full(b1_blk),
                full(w2_blk), full(b2_blk),
                full(w3_blk), full(b3_f32),
            ],
            out_specs=o_spec,
        ),
        compiler_params=pltpu.CompilerParams(
            dimension_semantics=("parallel",),
            vmem_limit_bytes=vmem_limit,
        ),
        cost_estimate=cost,
    )(xi_p, xj_p, w1_blk, b1_blk, w2_blk, b2_blk, w3_blk, b3_f32)

    # out[i, k, r] is the score of edge (i*tile_rows + r)*pack + k.
    scores = jnp.transpose(out, (0, 2, 1)).reshape(grid_n * tile_rows * pack)
    return scores[:N].reshape(N, 1)


def _init_params(key, in_channels, hidden_channels, out_channels):
    """Deterministic PyTorch-Linear-style init (uniform +-1/sqrt(fan_in))."""
    assert out_channels == 1

    def linear(k, fan_in, fan_out, pytorch_layout=False):
        kw, kb = jax.random.split(k)
        bound = 1.0 / jnp.sqrt(jnp.float32(fan_in))
        shape = (fan_out, fan_in) if pytorch_layout else (fan_in, fan_out)
        w = jax.random.uniform(kw, shape, jnp.float32, -bound, bound)
        b = jax.random.uniform(kb, (1, fan_out), jnp.float32, -bound, bound)
        return w, b

    k1, k2, k3 = jax.random.split(key, 3)
    w1, b1 = linear(k1, in_channels, hidden_channels)
    w2, b2 = linear(k2, hidden_channels, hidden_channels)
    w3, b3 = linear(k3, hidden_channels, out_channels, pytorch_layout=True)
    return (w1, b1, w2, b2, w3, b3)


def _reference(x_i, x_j, params):
    w1, b1, w2, b2, w3, b3 = params
    x = x_i.astype(jnp.float32) * x_j.astype(jnp.float32)
    x = jnp.maximum(x @ w1 + b1, 0.0)
    x = jnp.maximum(x @ w2 + b2, 0.0)
    return jax.nn.sigmoid(x @ w3.T + b3)


if __name__ == "__main__":
    # Module config: LinkPredictor(in=32, hidden=32, out=1, num_layers=3, dropout=0.5)
    in_channels, hidden_channels, out_channels = 32, 32, 1
    N = 256  # number of candidate edges

    key = jax.random.PRNGKey(0)
    k_i, k_j, k_p = jax.random.split(key, 3)
    # bf16 edge features from the caller (halves HBM traffic on the input streams).
    x_i = jax.random.normal(k_i, (N, in_channels), jnp.float32).astype(jnp.bfloat16)
    x_j = jax.random.normal(k_j, (N, in_channels), jnp.float32).astype(jnp.bfloat16)
    params = _init_params(k_p, in_channels, hidden_channels, out_channels)

    out = link_predictor(x_i, x_j, params)
    out = jax.block_until_ready(out)

    ref = _reference(x_i, x_j, params)
    assert out.shape == (N, out_channels)
    err = float(jnp.max(jnp.abs(out - ref)))
    # bf16 matmul operands (f32 accumulation) -> looser tolerance than pure f32.
    assert jnp.allclose(out, ref, atol=2.5e-2, rtol=2.5e-2), err
    print("KERNEL_OK")
</pallas_src>

<mosaic_0001>
module attributes {stable_mosaic.version = 11 : i64} {
  func.func @kernel(%arg0: i32, %arg1: memref<64x128xbf16, #tpu.memory_space<vmem>>, %arg2: memref<64x128xbf16, #tpu.memory_space<vmem>>, %arg3: memref<128x128xbf16, #tpu.memory_space<vmem>>, %arg4: memref<1x128xf32, #tpu.memory_space<vmem>>, %arg5: memref<128x128xbf16, #tpu.memory_space<vmem>>, %arg6: memref<1x128xf32, #tpu.memory_space<vmem>>, %arg7: memref<4x128xbf16, #tpu.memory_space<vmem>>, %arg8: memref<1x1xf32, #tpu.memory_space<vmem>>, %arg9: memref<1x4x64xf32, #tpu.memory_space<vmem>>) attributes {dimension_semantics = [#tpu.dimension_semantics<parallel>], iteration_bounds = array<i64: 1>, scalar_prefetch = 0 : i64, scratch_operands = 0 : i64, tpu.core_type = #tpu.core_type<tc>, window_params = [{transform_indices = @transform_0, window_bounds = array<i64: 64, 128>}, {transform_indices = @transform_1, window_bounds = array<i64: 64, 128>}, {pipeline_mode = #tpu.pipeline_mode<synchronous>, transform_indices = @transform_2, window_bounds = array<i64: 128, 128>}, {pipeline_mode = #tpu.pipeline_mode<synchronous>, transform_indices = @transform_3, window_bounds = array<i64: 1, 128>}, {pipeline_mode = #tpu.pipeline_mode<synchronous>, transform_indices = @transform_4, window_bounds = array<i64: 128, 128>}, {pipeline_mode = #tpu.pipeline_mode<synchronous>, transform_indices = @transform_5, window_bounds = array<i64: 1, 128>}, {pipeline_mode = #tpu.pipeline_mode<synchronous>, transform_indices = @transform_6, window_bounds = array<i64: 4, 128>}, {pipeline_mode = #tpu.pipeline_mode<synchronous>, transform_indices = @transform_7, window_bounds = array<i64: 1, 1>}, {transform_indices = @transform_8, window_bounds = array<i64: 1, 4, 64>}]} {
    %c0 = arith.constant 0 : index
    %c0_0 = arith.constant 0 : index
    %0 = vector.load %arg1[%c0, %c0_0] : memref<64x128xbf16, #tpu.memory_space<vmem>>, vector<64x128xbf16>
    %c0_1 = arith.constant 0 : index
    %c0_2 = arith.constant 0 : index
    %1 = vector.load %arg2[%c0_1, %c0_2] : memref<64x128xbf16, #tpu.memory_space<vmem>>, vector<64x128xbf16>
    %2 = arith.mulf %0, %1 : vector<64x128xbf16>
    %c0_3 = arith.constant 0 : index
    %c0_4 = arith.constant 0 : index
    %3 = vector.load %arg3[%c0_3, %c0_4] : memref<128x128xbf16, #tpu.memory_space<vmem>>, vector<128x128xbf16>
    %cst = arith.constant dense<0.000000e+00> : vector<64x128xf32>
    %4 = tpu.matmul %2, %3, %cst {dimension_numbers = #tpu.dot_dimension_numbers<[1], [0], [0], [1], [0, 0, 1, 1], [], []>} : vector<64x128xbf16>, vector<128x128xbf16>, vector<64x128xf32> -> vector<64x128xf32>
    %c0_5 = arith.constant 0 : index
    %c0_6 = arith.constant 0 : index
    %5 = vector.load %arg4[%c0_5, %c0_6] : memref<1x128xf32, #tpu.memory_space<vmem>>, vector<1x128xf32>
    %6 = vector.broadcast %5 : vector<1x128xf32> to vector<64x128xf32>
    %7 = arith.addf %4, %6 : vector<64x128xf32>
    %cst_7 = arith.constant 0.000000e+00 : f32
    %8 = vector.broadcast %cst_7 : f32 to vector<64x128xf32>
    %9 = arith.maximumf %7, %8 : vector<64x128xf32>
    %10 = arith.truncf %9 : vector<64x128xf32> to vector<64x128xbf16>
    %c0_8 = arith.constant 0 : index
    %c0_9 = arith.constant 0 : index
    %11 = vector.load %arg5[%c0_8, %c0_9] : memref<128x128xbf16, #tpu.memory_space<vmem>>, vector<128x128xbf16>
    %cst_10 = arith.constant dense<0.000000e+00> : vector<64x128xf32>
    %12 = tpu.matmul %10, %11, %cst_10 {dimension_numbers = #tpu.dot_dimension_numbers<[1], [0], [0], [1], [0, 0, 1, 1], [], []>} : vector<64x128xbf16>, vector<128x128xbf16>, vector<64x128xf32> -> vector<64x128xf32>
    %c0_11 = arith.constant 0 : index
    %c0_12 = arith.constant 0 : index
    %13 = vector.load %arg6[%c0_11, %c0_12] : memref<1x128xf32, #tpu.memory_space<vmem>>, vector<1x128xf32>
    %14 = vector.broadcast %13 : vector<1x128xf32> to vector<64x128xf32>
    %15 = arith.addf %12, %14 : vector<64x128xf32>
    %cst_13 = arith.constant 0.000000e+00 : f32
    %16 = vector.broadcast %cst_13 : f32 to vector<64x128xf32>
    %17 = arith.maximumf %15, %16 : vector<64x128xf32>
    %18 = arith.truncf %17 : vector<64x128xf32> to vector<64x128xbf16>
    %c0_14 = arith.constant 0 : index
    %c0_15 = arith.constant 0 : index
    %19 = vector.load %arg7[%c0_14, %c0_15] : memref<4x128xbf16, #tpu.memory_space<vmem>>, vector<4x128xbf16>
    %cst_16 = arith.constant dense<0.000000e+00> : vector<4x64xf32>
    %20 = tpu.matmul %19, %18, %cst_16 {dimension_numbers = #tpu.dot_dimension_numbers<[1], [1], [0], [0], [0, 0, 1, 0], [], []>} : vector<4x128xbf16>, vector<64x128xbf16>, vector<4x64xf32> -> vector<4x64xf32>
    %c0_17 = arith.constant 0 : index
    %c0_18 = arith.constant 0 : index
    %21 = vector.load %arg8[%c0_17, %c0_18] : memref<1x1xf32, #tpu.memory_space<vmem>>, vector<1x1xf32>
    %22 = vector.broadcast %21 : vector<1x1xf32> to vector<4x64xf32>
    %23 = arith.addf %20, %22 : vector<4x64xf32>
    %24 = arith.negf %23 : vector<4x64xf32>
    %25 = math.exp %24 : vector<4x64xf32>
    %cst_19 = arith.constant 1.000000e+00 : f32
    %26 = vector.broadcast %cst_19 : f32 to vector<4x64xf32>
    %27 = arith.addf %26, %25 : vector<4x64xf32>
    %28 = arith.divf %26, %27 : vector<4x64xf32>
    %c0_20 = arith.constant 0 : index
    %c0_21 = arith.constant 0 : index
    %c0_22 = arith.constant 0 : index
    %29 = vector.load %arg9[%c0_20, %c0_21, %c0_22] : memref<1x4x64xf32, #tpu.memory_space<vmem>>, vector<1x4x64xf32>
    %30 = vector.shape_cast %29 : vector<1x4x64xf32> to vector<4x64xf32>
    %31 = vector.shape_cast %28 : vector<4x64xf32> to vector<1x4x64xf32>
    tpu.vector_store %arg9[%c0_20, %c0_21, %c0_22], %31 {strides = array<i32>} : memref<1x4x64xf32, #tpu.memory_space<vmem>>, vector<1x4x64xf32>,
    return
  }
  func.func @transform_0(%arg0: i32) -> (i32, i32) {
    %c0_i32 = arith.constant 0 : i32
    %c0_i32_0 = arith.constant 0 : i32
    return %arg0, %c0_i32 : i32, i32
  }
  func.func @transform_1(%arg0: i32) -> (i32, i32) {
    %c0_i32 = arith.constant 0 : i32
    %c0_i32_0 = arith.constant 0 : i32
    return %arg0, %c0_i32 : i32, i32
  }
  func.func @transform_2(%arg0: i32) -> (i32, i32) {
    %c0_i32 = arith.constant 0 : i32
    %c0_i32_0 = arith.constant 0 : i32
    %c0_i32_1 = arith.constant 0 : i32
    return %c0_i32, %c0_i32_0 : i32, i32
  }
  func.func @transform_3(%arg0: i32) -> (i32, i32) {
    %c0_i32 = arith.constant 0 : i32
    %c0_i32_0 = arith.constant 0 : i32
    %c0_i32_1 = arith.constant 0 : i32
    return %c0_i32, %c0_i32_0 : i32, i32
  }
  func.func @transform_4(%arg0: i32) -> (i32, i32) {
    %c0_i32 = arith.constant 0 : i32
    %c0_i32_0 = arith.constant 0 : i32
    %c0_i32_1 = arith.constant 0 : i32
    return %c0_i32, %c0_i32_0 : i32, i32
  }
  func.func @transform_5(%arg0: i32) -> (i32, i32) {
    %c0_i32 = arith.constant 0 : i32
    %c0_i32_0 = arith.constant 0 : i32
    %c0_i32_1 = arith.constant 0 : i32
    return %c0_i32, %c0_i32_0 : i32, i32
  }
  func.func @transform_6(%arg0: i32) -> (i32, i32) {
    %c0_i32 = arith.constant 0 : i32
    %c0_i32_0 = arith.constant 0 : i32
    %c0_i32_1 = arith.constant 0 : i32
    return %c0_i32, %c0_i32_0 : i32, i32
  }
  func.func @transform_7(%arg0: i32) -> (i32, i32) {
    %c0_i32 = arith.constant 0 : i32
    %c0_i32_0 = arith.constant 0 : i32
    %c0_i32_1 = arith.constant 0 : i32
    return %c0_i32, %c0_i32_0 : i32, i32
  }
  func.func @transform_8(%arg0: i32) -> (i32, i32, i32) {
    %c0_i32 = arith.constant 0 : i32
    %c0_i32_0 = arith.constant 0 : i32
    %c0_i32_1 = arith.constant 0 : i32
    return %arg0, %c0_i32, %c0_i32_0 : i32, i32, i32
  }
}

</mosaic_0001>

<bundles_post_ra>
// kernel: tpu_custom_call.1
= control target key start
LH: loop header
LB: loop body
LE: loop exit
PB: predicated region body
PF: predicated region fallthrough
CT: control target
= control target key end

     0   :  { %s1067_s0 = inlined_call_operand.hbm [shape: bf16[64,128], index: 0, kind: input, shape index: {}]   ;;  %s1068_s1 = inlined_call_operand.hbm [shape: bf16[64,128], index: 1, kind: input, shape index: {}]   ;;  %s1069_s2 = inlined_call_operand.hbm [shape: bf16[128,128], index: 2, kind: input, shape index: {}]   ;;  %s1070_s3 = inlined_call_operand.hbm [shape: f32[1,128], index: 3, kind: input, shape index: {}]   ;;  %s1071_s4 = inlined_call_operand.hbm [shape: bf16[128,128], index: 4, kind: input, shape index: {}]   ;;  %s1072_s5 = inlined_call_operand.hbm [shape: f32[1,128], index: 5, kind: input, shape index: {}]   ;;  %s1073_s6 = inlined_call_operand.hbm [shape: bf16[4,128], index: 6, kind: input, shape index: {}]   ;;  %s1074_s7 = inlined_call_operand.<no memory space> [shape: f32[1,1], index: 7, kind: input, shape index: {}]   ;;  %s1075_s8 = inlined_call_operand.hbm [shape: f32[1,4,64], index: 8, kind: output, shape index: {}]  }
   0x1   :  { %v13_v0 = vstv %s1074_s7 }
   0x2   :  { %14 = vst [vmem:[#allocation2] sm:$0x1] %v13_v0 }
   0x3   :  { %15 = vsyncpa [#allocation4], 0 }
   0x4   :  { %16 = vsyncpa [#allocation7], 0 }
   0x5   :  { %17 = vsyncpa [#allocation10], 0 }
   0x6   :  { %18 = vsyncpa [#allocation13], 0 }
   0x7   :  { %19 = vsyncpa [#allocation5], 0  ;;  %s876_s29 = smov [#allocation6]   ;;  %s877_s9 = smov [#allocation9]  }
   0x8   :  { %s37_s30 = sshll.u32 %s876_s29, 4  ;;  %s62_s10 = sshll.u32 %s877_s9, 4  ;;  %s38_s30 = int_to_ptr.vmem [resolvable:$true] %s37_s30  ;;  %s937_s10 = int_to_ptr.vmem [resolvable:$true] %s62_s10 }
   0x9   :  { %s690_s13 = scalar_lea.hbm %s1068_s1, 512 }
   0xa   :  { %p691_p0 = scmp.ne.s32.totalorder %s1068_s1, %s690_s13  ;;  %p694_p1 = scmp.lt.u32.totalorder %s690_s13, %s1068_s1 }
   0xc   :  { %p696_p2 = pnand %p694_p1, %p691_p0 }
   0xe   :  { %699 = shalt.err (!%p696_p2)
}
   0xf   :  { %s700_s17 = scalar_lea.vmem %s38_s30, 512  ;;  %p705_p4 = scmp.lt.s32.totalorder %s38_s30, %s38_s30 }
  0x10   :  { %p701_p3 = scmp.ne.s32.totalorder %s38_s30, %s700_s17  ;;  %p706_p5 = scmp.lt.s32.totalorder %s700_s17, %s700_s17 }
  0x12   :  { %p707_p6 = por %p706_p5, %p705_p4 }
  0x14   :  { %p708_p7 = pnand %p707_p6, %p701_p3 }
  0x16   :  { %711 = shalt.err (!%p708_p7)
}
  0x17   :  { %s878_s18 = smov 64   ;;  %s879_s19 = smov 4  }
  0x18   :  { %43 = dma.hbm_to_vmem [thread:$0]  %s1068_s1, 512, %s38_s30, [#allocation7], %s878_s18, %s878_s18, %s879_s19  }
  0x19   :  { %s712_s24 = scalar_lea.hbm %s1070_s3, 16 }
  0x1a   :  { %p713_p8 = scmp.ne.s32.totalorder %s1070_s3, %s712_s24  ;;  %p716_p9 = scmp.lt.u32.totalorder %s712_s24, %s1070_s3 }
  0x1c   :  { %p718_p10 = pnand %p716_p9, %p713_p8 }
  0x1e   :  { %721 = shalt.err (!%p718_p10)
}
  0x1f   :  { %s722_s29 = scalar_lea.vmem %s937_s10, 16  ;;  %s726_s1 = scalar_lea.vmem %s937_s10, 32 }
  0x20   :  { %p723_p11 = scmp.ne.s32.totalorder %s937_s10, %s722_s29  ;;  %p727_p12 = scmp.lt.s32.totalorder %s937_s10, %s937_s10 }
  0x21   :  { %p728_p13 = scmp.lt.s32.totalorder %s726_s1, %s722_s29 }
  0x23   :  { %p729_p0 = por %p728_p13, %p727_p12 }
  0x25   :  { %p730_p1 = pnand %p729_p0, %p723_p11 }
  0x27   :  { %733 = shalt.err (!%p730_p1)
}
  0x28   :  { %65 = dma.hbm_to_vmem [thread:$0]  %s1070_s3, 16, %s937_s10, [#allocation10]  }
  0x29   :  { %s880_s11 = smov [#allocation12]   ;;  %s881_s13 = smov [#allocation3]  }
  0x2a   :  { %s84_s12 = sshll.u32 %s880_s11, 4  ;;  %s25_s14 = sshll.u32 %s881_s13, 4  ;;  %s85_s12 = int_to_ptr.vmem [resolvable:$true] %s84_s12  ;;  %s972_s14 = int_to_ptr.vmem [resolvable:$true] %s25_s14 }
  0x2b   :  { %s734_s16 = scalar_lea.hbm %s1072_s5, 16 }
  0x2c   :  { %p735_p2 = scmp.ne.s32.totalorder %s1072_s5, %s734_s16  ;;  %p738_p3 = scmp.lt.u32.totalorder %s734_s16, %s1072_s5 }
  0x2e   :  { %p740_p4 = pnand %p738_p3, %p735_p2 }
  0x30   :  { %743 = shalt.err (!%p740_p4)
}
  0x31   :  { %s744_s3 = scalar_lea.vmem %s85_s12, 16  ;;  %s748_s10 = scalar_lea.vmem %s85_s12, 32 }
  0x32   :  { %p745_p5 = scmp.ne.s32.totalorder %s85_s12, %s744_s3  ;;  %p749_p6 = scmp.lt.s32.totalorder %s85_s12, %s85_s12 }
  0x33   :  { %p750_p7 = scmp.lt.s32.totalorder %s748_s10, %s744_s3 }
  0x35   :  { %p751_p8 = por %p750_p7, %p749_p6 }
  0x37   :  { %p752_p9 = pnand %p751_p8, %p745_p5 }
  0x39   :  { %755 = shalt.err (!%p752_p9)
}
  0x3a   :  { %87 = dma.hbm_to_vmem [thread:$0]  %s1072_s5, 16, %s85_s12, [#allocation13]  }
  0x3b   :  { %s756_s27 = scalar_lea.hbm %s1067_s0, 512 }
  0x3c   :  { %p757_p10 = scmp.ne.s32.totalorder %s1067_s0, %s756_s27  ;;  %p760_p11 = scmp.lt.u32.totalorder %s756_s27, %s1067_s0 }
  0x3e   :  { %p762_p12 = pnand %p760_p11, %p757_p10 }
  0x40   :  { %765 = shalt.err (!%p762_p12)
}
  0x41   :  { %s766_s9 = scalar_lea.vmem %s972_s14, 512  ;;  %p771_p0 = scmp.lt.s32.totalorder %s972_s14, %s972_s14 }
  0x42   :  { %p767_p13 = scmp.ne.s32.totalorder %s972_s14, %s766_s9  ;;  %p772_p1 = scmp.lt.s32.totalorder %s766_s9, %s766_s9 }
  0x44   :  { %p773_p2 = por %p772_p1, %p771_p0 }
  0x46   :  { %p774_p3 = pnand %p773_p2, %p767_p13 }
  0x48   :  { %777 = shalt.err (!%p774_p3)
}
  0x49   :  { %31 = dma.hbm_to_vmem [thread:$0]  %s1067_s0, 512, %s972_s14, [#allocation4], %s878_s18, %s878_s18, %s879_s19  }
  0x4a   :  { %s882_s12 = smov [#allocation8]   ;;  %s883_s15 = smov [#allocation11]  }
  0x4b   :  { %s49_s13 = sshll.u32 %s882_s12, 4  ;;  %s71_s7 = sshll.u32 %s883_s15, 4  ;;  %s50_s13 = int_to_ptr.vmem [resolvable:$true] %s49_s13  ;;  %s1006_s7 = int_to_ptr.vmem [resolvable:$true] %s71_s7 }
  0x4c   :  { %s778_s20 = scalar_lea.hbm %s1069_s2, 1024 }
  0x4d   :  { %p779_p4 = scmp.ne.s32.totalorder %s1069_s2, %s778_s20  ;;  %p782_p5 = scmp.lt.u32.totalorder %s778_s20, %s1069_s2 }
  0x4f   :  { %p784_p6 = pnand %p782_p5, %p779_p4 }
  0x51   :  { %787 = shalt.err (!%p784_p6)
}
  0x52   :  { %s788_s0 = scalar_lea.vmem %s50_s13, 1024  ;;  %p793_p8 = scmp.lt.s32.totalorder %s50_s13, %s50_s13 }
  0x53   :  { %p789_p7 = scmp.ne.s32.totalorder %s50_s13, %s788_s0  ;;  %p794_p9 = scmp.lt.s32.totalorder %s788_s0, %s788_s0 }
  0x55   :  { %p795_p10 = por %p794_p9, %p793_p8 }
  0x57   :  { %p796_p11 = pnand %p795_p10, %p789_p7 }
  0x59   :  { %799 = shalt.err (!%p796_p11)
}
  0x5a   :  { %55 = dma.hbm_to_vmem [thread:$0]  %s1069_s2, 1024, %s50_s13, [#allocation7], %s878_s18, %s878_s18, %s879_s19  }
  0x5b   :  { %s800_s26 = scalar_lea.hbm %s1071_s4, 1024 }
  0x5c   :  { %p801_p12 = scmp.ne.s32.totalorder %s1071_s4, %s800_s26  ;;  %p804_p13 = scmp.lt.u32.totalorder %s800_s26, %s1071_s4 }
  0x5e   :  { %p806_p0 = pnand %p804_p13, %p801_p12 }
  0x60   :  { %809 = shalt.err (!%p806_p0)
}
  0x61   :  { %s810_s30 = scalar_lea.vmem %s1006_s7, 1024  ;;  %p815_p2 = scmp.lt.s32.totalorder %s1006_s7, %s1006_s7 }
  0x62   :  { %p811_p1 = scmp.ne.s32.totalorder %s1006_s7, %s810_s30  ;;  %p816_p3 = scmp.lt.s32.totalorder %s810_s30, %s810_s30 }
  0x64   :  { %p817_p4 = por %p816_p3, %p815_p2 }
  0x66   :  { %p818_p5 = pnand %p817_p4, %p811_p1 }
  0x68   :  { %821 = shalt.err (!%p818_p5)
}
  0x69   :  { %77 = dma.hbm_to_vmem [thread:$0]  %s1071_s4, 1024, %s1006_s7, [#allocation10], %s878_s18, %s878_s18, %s879_s19  }
  0x6a   :  { %s884_s5 = smov [#allocation14]   ;;  %s822_s15 = scalar_lea.hbm %s1073_s6, 32 }
  0x6b   :  { %s94_s11 = sshll.u32 %s884_s5, 4  ;;  %p823_p6 = scmp.ne.s32.totalorder %s1073_s6, %s822_s15  ;;  %s95_s11 = int_to_ptr.vmem [resolvable:$true] %s94_s11 }
  0x6c   :  { %p826_p7 = scmp.lt.u32.totalorder %s822_s15, %s1073_s6 }
  0x6e   :  { %p828_p8 = pnand %p826_p7, %p823_p6 }
  0x70   :  { %831 = shalt.err (!%p828_p8)
}
  0x71   :  { %s832_s22 = scalar_lea.vmem %s95_s11, 32  ;;  %p837_p10 = scmp.lt.s32.totalorder %s95_s11, %s95_s11 }
  0x72   :  { %p833_p9 = scmp.ne.s32.totalorder %s95_s11, %s832_s22  ;;  %p838_p11 = scmp.lt.s32.totalorder %s832_s22, %s832_s22 }
  0x74   :  { %p839_p12 = por %p838_p11, %p837_p10 }
  0x76   :  { %p840_p13 = pnand %p839_p12, %p833_p9 }
  0x78   :  { %843 = shalt.err (!%p840_p13)
}
  0x79   :  { %97 = dma.hbm_to_vmem [thread:$0]  %s1073_s6, 32, %s95_s11, [#allocation13]  }
  0x7a   :  { %866 = dma.done.wait [#allocation4], 512  }
  0x7b   :  { %867 = vsyncadd [#allocation4], 4294966784 }
  0x7c   :  { %868 = dma.done.wait [#allocation7], 1536  }
  0x7d   :  { %869 = vsyncadd [#allocation7], 4294965760 }
  0x7e   :  { %870 = dma.done.wait [#allocation10], 1040  }
  0x7f   :  { %871 = vsyncadd [#allocation10], 4294966256 }
  0x80   :  { %872 = dma.done.wait [#allocation13], 48  }
  0x81   :  { %873 = vsyncadd [#allocation13], 4294967248  ;;  %v670_v1 = vld [vmem:[#allocation8] sm:$0xff]   ;;  %v671_v2 = vld [vmem:[#allocation8 + $0x8] sm:$0xff]   ;;  %vm886_vm0 = vmmov 0   ;;  %s888_s6 = smov [#allocation15]  }
  0x82   :  { %596 = vmatprep.subr.bf16.mxu0 %v670_v1  ;;  %v672_v3 = vld [vmem:[#allocation8 + $0x10] sm:$0xff]   ;;  %v673_v4 = vld [vmem:[#allocation8 + $0x18] sm:$0xff]   ;;  %v122_v5 = vld [vmem:[#allocation3] sm:$0xf]  ;;  %s531_s19 = sshll.u32 %s888_s6, 4  ;;  %vm523_vm1 = vcmask 519168   ;;  %s532_s19 = int_to_ptr.vmem [resolvable:$true] %s531_s19 }
  0x83   :  { %597 = vmatpush3.bf16.msra.mxu0 %v670_v1  ;;  %v123_v6 = vld [vmem:[#allocation3 + $0x4] sm:$0xf]  ;;  %v130_v7 = vld [vmem:[#allocation6] sm:$0xf]  ;;  %v679_v14 = vld [vmem:[#allocation11 + $0x8] sm:$0xff]   ;;  %s844_s7 = scalar_lea.vmem %s532_s19, 64  ;;  %p849_p1 = scmp.lt.s32.totalorder %s532_s19, %s532_s19 }
  0x84   :  { %598 = vmatprep.subr.bf16.mxu0 %v671_v2  ;;  %v131_v8 = vld [vmem:[#allocation6 + $0x4] sm:$0xf]  ;;  %v138_v9 = vmul.bf16 %v130_v7, %v122_v5  ;;  %v675_v15 = vld [vmem:[#allocation8 + $0x28] sm:$0xff]   ;;  %v680_v16 = vld [vmem:[#allocation11 + $0x10] sm:$0xff]   ;;  %p845_p0 = scmp.ne.s32.totalorder %s532_s19, %s844_s7  ;;  %p850_p2 = scmp.lt.s32.totalorder %s844_s7, %s844_s7 }
  0x85   :  { %v139_v10 = vmul.bf16 %v131_v8, %v123_v6  ;;  %v674_v11 = vld [vmem:[#allocation8 + $0x20] sm:$0xff]   ;;  %v676_v17 = vld [vmem:[#allocation8 + $0x30] sm:$0xff]   ;;  %v677_v18 = vld [vmem:[#allocation8 + $0x38] sm:$0xff]  }
  0x86   :  { %v678_v13 = vld [vmem:[#allocation11] sm:$0xff]   ;;  %v125_v20 = vld [vmem:[#allocation3 + $0xc] sm:$0xf]  ;;  %v681_v21 = vld [vmem:[#allocation11 + $0x18] sm:$0xff]   ;;  %p851_p3 = por %p850_p2, %p849_p1 }
  0x87   :  { %599 = vmatpush3.bf16.msra.mxu0 %v671_v2  ;;  %v544_v12 = vcombine.low %v138_v9, %v139_v10  ;;  %620 = vmatprep.subr.bf16.mxu1 %v678_v13  ;;  %v124_v19 = vld [vmem:[#allocation3 + $0x8] sm:$0xf]  ;;  %v133_v23 = vld [vmem:[#allocation6 + $0xc] sm:$0xf]  ;;  %v126_v24 = vld [vmem:[#allocation3 + $0x10] sm:$0xf] }
  0x88   :  { %600 = vmatprep.subr.bf16.mxu0 %v672_v3  ;;  %621 = vmatpush3.bf16.msra.mxu1 %v678_v13  ;;  %v132_v22 = vld [vmem:[#allocation6 + $0x8] sm:$0xf]  ;;  %v127_v25 = vld [vmem:[#allocation3 + $0x14] sm:$0xf]  ;;  %v134_v26 = vld [vmem:[#allocation6 + $0x10] sm:$0xf]  ;;  %v141_v29 = vmul.bf16 %v133_v23, %v125_v20  ;;  %p852_p4 = pnand %p851_p3, %p845_p0 }
  0x89   :  { %612 = vmatprep.mubr.bf16.mxu0 %v544_v12  ;;  %622 = vmatprep.subr.bf16.mxu1 %v679_v14  ;;  %v135_v27 = vld [vmem:[#allocation6 + $0x14] sm:$0xf]  ;;  %v140_v28 = vmul.bf16 %v132_v22, %v124_v19  ;;  %v682_v30 = vld [vmem:[#allocation11 + $0x20] sm:$0xff]   ;;  %v142_v31 = vmul.bf16 %v134_v26, %v126_v24  ;;  %v128_v34 = vld [vmem:[#allocation3 + $0x18] sm:$0xf]  ;;  %v885_v10 = vmov 0.0  }
  0x8a   :  { %v143_v32 = vmul.bf16 %v135_v27, %v127_v25  ;;  %v683_v35 = vld [vmem:[#allocation11 + $0x28] sm:$0xff]   ;;  %v129_v37 = vld [vmem:[#allocation3 + $0x1c] sm:$0xf]  ;;  %v136_v38 = vld [vmem:[#allocation6 + $0x18] sm:$0xf]  ;;  %v887_v12 = vmov 0  }
  0x8b   :  { %601 = vmatpush3.bf16.msra.mxu0 %v672_v3  ;;  %v545_v33 = vcombine.low %v140_v28, %v141_v29  ;;  %v137_v39 = vld [vmem:[#allocation6 + $0x1c] sm:$0xf]  ;;  %v144_v40 = vmul.bf16 %v136_v38, %v128_v34  ;;  %v684_v43 = vld [vmem:[#allocation11 + $0x30] sm:$0xff]   ;;  %v543_v45 = vld [vmem:[#allocation9] ss:$0 sm:$0xff]  ;;  %669 = vset.pattern.permute.xlu0 %v887_v12 }
  0x8c   :  { %602 = vmatprep.subr.bf16.mxu0 %v673_v4  ;;  %623 = vmatpush3.bf16.msra.mxu1 %v679_v14  ;;  %v546_v36 = vcombine.low %v142_v31, %v143_v32  ;;  %v145_v41 = vmul.bf16 %v137_v39, %v129_v37  ;;  %v685_v44 = vld [vmem:[#allocation11 + $0x38] sm:$0xff]   ;;  %v556_v13 = vld [vmem:[#allocation12] ss:$0 sm:$0xff] }
  0x8d   :  { %624 = vmatprep.subr.bf16.mxu1 %v680_v16 }
  0x8e   :  { %v547_v42 = vcombine.low %v144_v40, %v145_v41 }
  0x8f   :  { %603 = vmatpush3.bf16.msra.mxu0 %v673_v4 }
  0x90   :  { %604 = vmatprep.subr.bf16.mxu0 %v674_v11  ;;  %625 = vmatpush3.bf16.msra.mxu1 %v680_v16 }
  0x91   :  { %626 = vmatprep.subr.bf16.mxu1 %v681_v21 }
  0x93   :  { %605 = vmatpush3.bf16.msra.mxu0 %v674_v11  ;;  %v565_v11 = vld [vmem:[#allocation2] ss:$0 sm:$0xff] }
  0x94   :  { %606 = vmatprep.subr.bf16.mxu0 %v675_v15  ;;  %627 = vmatpush3.bf16.msra.mxu1 %v681_v21 }
  0x95   :  { %628 = vmatprep.subr.bf16.mxu1 %v682_v30  ;;  %474 = vperm.xlu0 %669, %v565_v11  }
  0x97   :  { %607 = vmatpush3.bf16.msra.mxu0 %v675_v15 }
  0x98   :  { %608 = vmatprep.subr.bf16.mxu0 %v676_v17  ;;  %629 = vmatpush3.bf16.msra.mxu1 %v682_v30 }
  0x99   :  { %630 = vmatprep.subr.bf16.mxu1 %v683_v35 }
  0x9b   :  { %609 = vmatpush3.bf16.msra.mxu0 %v676_v17 }
  0x9c   :  { %610 = vmatprep.subr.bf16.mxu0 %v677_v18  ;;  %631 = vmatpush3.bf16.msra.mxu1 %v683_v35 }
  0x9d   :  { %632 = vmatprep.subr.bf16.mxu1 %v684_v43 }
  0x9f   :  { %611 = vmatpush3.bf16.msra.mxu0 %v677_v18 }
  0xa0   :  { %633 = vmatpush3.bf16.msra.mxu1 %v684_v43  ;;  %644 = vmatprep.subr.bf16.mxu0 %v885_v10 }
  0xa1   :  { %634 = vmatprep.subr.bf16.mxu1 %v685_v44 }
  0xa2   :  { %613 = vmatmul.mubr.bf16.vlgmr.msra.gmra.mrb[0].mxu0 %v545_v33 }
  0xa3   :  { %616 = vmatprep.mubr.bf16.mxu0 %v546_v36 }
  0xa4   :  { %635 = vmatpush3.bf16.msra.mxu1 %v685_v44 }
  0xaa   :  { %617 = vmatmul.mubr.bf16.gmra.mrb[4].mxu0 %v547_v42  ;;  %v466_v42 = vld [vmem:[#allocation14] sm:$0x3] }
  0xab   :  { %652 = vmatprep.mubr.msk.bf16.mxu0 %vm886_vm0, %v885_v10 }
 0x114   :  { %v475_v43 = vpop.permute.xlu0 %474 }
 0x175   :  { %v614_v46 = vpop.f32.mrb[0].mxu0 }
 0x176   :  { %v284_v47 = vadd.f32 %v614_v46, %v543_v45  ;;  %v275_v48 = vpop.f32.mrb[1].mxu0 }
 0x177   :  { %v276_v49 = vadd.f32 %v543_v45, %v275_v48  ;;  %v615_v50 = vpop.f32.mrb[2].mxu0 }
 0x178   :  { %v287_v51 = vadd.f32 %v615_v50, %v543_v45  ;;  %v278_v52 = vpop.f32.mrb[3].mxu0  ;;  %v308_v54 = vmax.f32 %v284_v47, 0.0 }
 0x179   :  { %v279_v53 = vadd.f32 %v543_v45, %v278_v52  ;;  %v306_v56 = vmax.f32 %v276_v49, 0.0 }
 0x17a   :  { %v309_v55 = vmax.f32 %v287_v51, 0.0 }
 0x17b   :  { %v307_v57 = vmax.f32 %v279_v53, 0.0 }
 0x17c   :  { %v315_v58 = vpack.c.bf16 %v309_v55, %v308_v54 }
 0x17d   :  { %v618_v59 = vpop.f32.mrb[4].mxu0  ;;  %v314_v60 = vpack.c.bf16 %v307_v57, %v306_v56 }
 0x17e   :  { %v300_v61 = vadd.f32 %v618_v59, %v543_v45  ;;  %v291_v62 = vpop.f32.mrb[5].mxu0 }
 0x17f   :  { %v292_v63 = vadd.f32 %v543_v45, %v291_v62  ;;  %636 = vmatprep.mubr.bf16.mxu1 %v314_v60  ;;  %v619_v0 = vpop.f32.mrb[6].mxu0 }
 0x180   :  { %v312_v1 = vmax.f32 %v300_v61, 0.0  ;;  %v303_v2 = vadd.f32 %v619_v0, %v543_v45  ;;  %637 = vmatmul.mubr.bf16.vlgmr.msra.gmra.mrb[0].mxu1 %v315_v58  ;;  %v294_v3 = vpop.f32.mrb[7].mxu0 }
 0x181   :  { %v310_v4 = vmax.f32 %v292_v63, 0.0  ;;  %v295_v5 = vadd.f32 %v543_v45, %v294_v3 }
 0x182   :  { %v313_v6 = vmax.f32 %v303_v2, 0.0 }
 0x183   :  { %v311_v7 = vmax.f32 %v295_v5, 0.0 }
 0x184   :  { %v317_v8 = vpack.c.bf16 %v313_v6, %v312_v1 }
 0x185   :  { %v316_v9 = vpack.c.bf16 %v311_v7, %v310_v4 }
 0x187   :  { %640 = vmatprep.mubr.bf16.mxu1 %v316_v9 }
 0x188   :  { %641 = vmatmul.mubr.bf16.gmra.mrb[4].mxu1 %v317_v8 }
 0x253   :  { %v638_v14 = vpop.f32.mrb[0].mxu1 }
 0x254   :  { %v432_v15 = vadd.f32 %v638_v14, %v556_v13  ;;  %v423_v16 = vpop.f32.mrb[1].mxu1 }
 0x255   :  { %v424_v17 = vadd.f32 %v556_v13, %v423_v16  ;;  %v639_v18 = vpop.f32.mrb[2].mxu1 }
 0x256   :  { %v435_v19 = vadd.f32 %v639_v18, %v556_v13  ;;  %v426_v20 = vpop.f32.mrb[3].mxu1  ;;  %v456_v22 = vmax.f32 %v432_v15, 0.0 }
 0x257   :  { %v427_v21 = vadd.f32 %v556_v13, %v426_v20  ;;  %v454_v24 = vmax.f32 %v424_v17, 0.0 }
 0x258   :  { %v457_v23 = vmax.f32 %v435_v19, 0.0 }
 0x259   :  { %v455_v25 = vmax.f32 %v427_v21, 0.0 }
 0x25a   :  { %v463_v26 = vpack.c.bf16 %v457_v23, %v456_v22 }
 0x25b   :  { %v462_v27 = vpack.c.bf16 %v455_v25, %v454_v24  ;;  %v642_v28 = vpop.f32.mrb[4].mxu1 }
 0x25c   :  { %v448_v29 = vadd.f32 %v642_v28, %v556_v13  ;;  %v439_v30 = vpop.f32.mrb[5].mxu1 }
 0x25d   :  { %v440_v31 = vadd.f32 %v556_v13, %v439_v30  ;;  %645 = vmatpush3.bf16.xpose.msra.mxu0 %v462_v27  ;;  %v643_v32 = vpop.f32.mrb[6].mxu1 }
 0x25e   :  { %v460_v33 = vmax.f32 %v448_v29, 0.0  ;;  %v451_v34 = vadd.f32 %v643_v32, %v556_v13  ;;  %v442_v35 = vpop.f32.mrb[7].mxu1  ;;  %646 = vmatprep.subr.bf16.mxu0 %v885_v10 }
 0x25f   :  { %v458_v36 = vmax.f32 %v440_v31, 0.0  ;;  %v443_v37 = vadd.f32 %v556_v13, %v442_v35 }
 0x260   :  { %v461_v38 = vmax.f32 %v451_v34, 0.0 }
 0x261   :  { %v459_v39 = vmax.f32 %v443_v37, 0.0 }
 0x262   :  { %v465_v40 = vpack.c.bf16 %v461_v38, %v460_v33 }
 0x263   :  { %v464_v41 = vpack.c.bf16 %v459_v39, %v458_v36 }
 0x265   :  { %647 = vmatpush3.bf16.xpose.msra.mxu0 %v463_v26 }
 0x266   :  { %648 = vmatprep.subr.bf16.mxu0 %v885_v10 }
 0x26d   :  { %649 = vmatpush3.bf16.xpose.msra.mxu0 %v464_v41 }
 0x26e   :  { %650 = vmatprep.subr.bf16.mxu0 %v885_v10 }
 0x275   :  { %651 = vmatpush3.bf16.xpose.msra.mxu0 %v465_v40 }
 0x27c   :  { %653 = vmatmul.mubr.bf16.vlgmr.msra.gmra.mrb[8].mxu0 %v466_v42 }
 0x34f   :  { %v511_v44 = vpop.f32.mrb[8].mxu0 }
 0x350   :  { %v512_v45 = vadd.f32 %v511_v44, %v475_v43  ;;  %v654_v46 = vpop.f32.mrb[9].mxu0 }
 0x351   :  { %v514_v47 = vpop.f32.mrb[10].mxu0 }
 0x352   :  { %v566_v48 = vmul.f32 -1.442695, %v512_v45  ;;  %v655_v49 = vpop.f32.mrb[11].mxu0 }
 0x354   :  { %686 = vpow2.f32 %v566_v48 }
 0x35e   :  { %v687_v50 = vpop.eup %686 }
 0x35f   :  { %v520_v51 = vadd.f32 1.0, %v687_v50 }
 0x361   :  { %688 = vrcp.f32 %v520_v51 }
 0x36b   :  { %v689_v52 = vpop.eup %688 }
 0x36c   :  { %524 = vst.msk [vmem:[#allocation15] sm:$0xf] %vm523_vm1, %v689_v52 }
 0x36d   :  { %855 = shalt.err (!%p852_p4)
}
 0x36e   :  { %s856_s0 = scalar_lea.hbm %s1075_s8, 64 }
 0x36f   :  { %p857_p5 = scmp.ne.s32.totalorder %s1075_s8, %s856_s0  ;;  %p860_p6 = scmp.lt.u32.totalorder %s856_s0, %s1075_s8 }
 0x371   :  { %p862_p7 = pnand %p860_p6, %p857_p5 }
 0x373   :  { %865 = shalt.err (!%p862_p7)
}
 0x374   :  { %534 = dma.vmem_to_hbm [thread:$0]  %s532_s19, 64, %s1075_s8, [#allocation5]  }
 0x375   :  { %874 = dma.done.wait [#allocation5], 64  }
 0x376   :  { %875 = vsyncadd [#allocation5], 4294967232 }
 0x377   :  { %538 = vsyncpa [#allocation4], 1 }
 0x378   :  { %539 = vsyncpa [#allocation7], 1 }
 0x379   :  { %540 = vsyncpa [#allocation10], 1 }
 0x37a   :  { %541 = vsyncpa [#allocation13], 1 }
 0x37b   :  { %542 = vsyncpa [#allocation5], 1 }

</bundles_post_ra>
